<compile_context>
chip_gen: v6e
topology: v6e:2x2x1
jax: 0.10.0
libtpu: 0.0.40
codegen_flags: <defaults>
</compile_context>

<pallas_src>
import jax
import jax.numpy as jnp
from jax.experimental import pallas as pl
from jax.experimental.pallas import tpu as pltpu


def _l2norm_kernel(x_ref, o_ref):
    # x_ref / o_ref: (BN, C, TL) tiles; reduction is over the channel axis (axis=1).
    x = x_ref[...].astype(jnp.float32)                   # cast in VMEM only
    ss = jnp.sum(x * x, axis=1, keepdims=True)           # (BN, 1, TL)
    norm = jnp.sqrt(ss)
    clip = jnp.maximum(norm, 0.0)                        # torch.clamp(min=0): no-op, kept for parity
    o_ref[...] = (x / clip).astype(o_ref.dtype)          # broadcast over channels


def _choose_lane_tile(L: int, max_tile: int = 2048) -> int:
    """Largest lane tile that is a multiple of 128, divides L, and is <= max_tile.
    Falls back to the full extent (always legal for a BlockSpec)."""
    if L % 128 != 0 or L <= max_tile:
        return L
    t = max_tile - (max_tile % 128)
    while t >= 128:
        if L % t == 0:
            return t
        t -= 128
    return L


def _choose_batch_tile(n: int, c: int, tl: int, itemsize: int,
                       budget_bytes: int = 4 << 20) -> int:
    """How many batch slices per block, keeping one (BN, C, TL) tile <= budget
    (double-buffered in + out then stays far under the 32 MiB scoped-VMEM default)."""
    per_slice = max(c * tl * itemsize, 1)
    bn = max(1, min(n, budget_bytes // per_slice))
    while n % bn != 0:
        bn -= 1
    return bn


def norm_l2(x: jnp.ndarray) -> jnp.ndarray:
    """x / ||x||_2 along the channel dim of an NCHW tensor."""
    n, c, h, w = x.shape
    L = h * w

    # Free reshapes (contiguous collapse of the trailing dims) -> no extra HBM traffic.
    x3 = x.reshape(n, c, L)

    tl = _choose_lane_tile(L)                       # lane tile (multiple of 128 or full)
    bn = _choose_batch_tile(n, c, tl, x.dtype.itemsize)

    grid = (n // bn, L // tl)

    out3 = pl.pallas_call(
        _l2norm_kernel,
        out_shape=jax.ShapeDtypeStruct((n, c, L), x.dtype),
        grid_spec=pltpu.PrefetchScalarGridSpec(
            num_scalar_prefetch=0,
            grid=grid,
            in_specs=[
                pl.BlockSpec((bn, c, tl), lambda i, j: (i, 0, j)),
            ],
            out_specs=pl.BlockSpec((bn, c, tl), lambda i, j: (i, 0, j)),
        ),
        compiler_params=pltpu.CompilerParams(
            # Both grid axes are independent -> shard across v7x's 2 TensorCores.
            dimension_semantics=("parallel", "parallel"),
            # Explicit budget sized for v7x's 64 MiB physical VMEM.
            vmem_limit_bytes=32 * 1024 * 1024,
        ),
    )(x3)

    return out3.reshape(n, c, h, w)


def _reference(x: jnp.ndarray) -> jnp.ndarray:
    """Pure-JAX reference with the same math."""
    xf = x.astype(jnp.float32)
    norm = jnp.sqrt(jnp.sum(xf * xf, axis=1, keepdims=True))
    clip = jnp.maximum(norm, 0.0)
    return (xf / clip).astype(x.dtype)


if __name__ == "__main__":
    key = jax.random.PRNGKey(0)
    # Small shapes consistent with the module: batch=2, channels=4, spatial=16x16.
    x = jax.random.normal(key, (2, 4, 16, 16), dtype=jnp.float32)

    out = norm_l2(x)
    jax.block_until_ready(out)

    ref = _reference(x)
    assert out.shape == x.shape
    assert jnp.allclose(out, ref, atol=1e-5, rtol=1e-5)

    print("KERNEL_OK")
</pallas_src>

<mosaic_0001>
module attributes {stable_mosaic.version = 11 : i64} {
  func.func @_l2norm_kernel(%arg0: i32, %arg1: i32, %arg2: memref<2x4x256xf32, #tpu.memory_space<vmem>>, %arg3: memref<2x4x256xf32, #tpu.memory_space<vmem>>) attributes {dimension_semantics = [#tpu.dimension_semantics<parallel>, #tpu.dimension_semantics<parallel>], iteration_bounds = array<i64: 1, 1>, scalar_prefetch = 0 : i64, scratch_operands = 0 : i64, tpu.core_type = #tpu.core_type<tc>, window_params = [{transform_indices = @transform_0, window_bounds = array<i64: 2, 4, 256>}, {transform_indices = @transform_1, window_bounds = array<i64: 2, 4, 256>}]} {
    %c0 = arith.constant 0 : index
    %c0_0 = arith.constant 0 : index
    %c0_1 = arith.constant 0 : index
    %0 = vector.load %arg2[%c0, %c0_0, %c0_1] : memref<2x4x256xf32, #tpu.memory_space<vmem>>, vector<2x4x256xf32>
    %1 = arith.mulf %0, %0 : vector<2x4x256xf32>
    %cst = arith.constant dense<0.000000e+00> : vector<2x256xf32>
    %2 = vector.multi_reduction <add>, %1, %cst [1] : vector<2x4x256xf32> to vector<2x256xf32>
    %3 = vector.shape_cast %2 : vector<2x256xf32> to vector<2x1x256xf32>
    %4 = math.sqrt %3 : vector<2x1x256xf32>
    %cst_2 = arith.constant 0.000000e+00 : f32
    %5 = vector.broadcast %cst_2 : f32 to vector<2x1x256xf32>
    %6 = arith.maximumf %4, %5 : vector<2x1x256xf32>
    %7 = vector.broadcast %6 : vector<2x1x256xf32> to vector<2x4x256xf32>
    %8 = arith.divf %0, %7 : vector<2x4x256xf32>
    %c0_3 = arith.constant 0 : index
    %c0_4 = arith.constant 0 : index
    %c0_5 = arith.constant 0 : index
    %9 = vector.load %arg3[%c0_3, %c0_4, %c0_5] : memref<2x4x256xf32, #tpu.memory_space<vmem>>, vector<2x4x256xf32>
    tpu.vector_store %arg3[%c0_3, %c0_4, %c0_5], %8 {strides = array<i32>} : memref<2x4x256xf32, #tpu.memory_space<vmem>>, vector<2x4x256xf32>,
    return
  }
  func.func @transform_0(%arg0: i32, %arg1: i32) -> (i32, i32, i32) {
    %c0_i32 = arith.constant 0 : i32
    %c0_i32_0 = arith.constant 0 : i32
    return %arg0, %c0_i32, %arg1 : i32, i32, i32
  }
  func.func @transform_1(%arg0: i32, %arg1: i32) -> (i32, i32, i32) {
    %c0_i32 = arith.constant 0 : i32
    %c0_i32_0 = arith.constant 0 : i32
    return %arg0, %c0_i32, %arg1 : i32, i32, i32
  }
}

</mosaic_0001>

<bundles_post_ra>
// kernel: tpu_custom_call.1
= control target key start
LH: loop header
LB: loop body
LE: loop exit
PB: predicated region body
PF: predicated region fallthrough
CT: control target
= control target key end

     0   :  { %6 = vsyncpa [#allocation3], 0  ;;  %s224_s0 = inlined_call_operand.hbm [shape: f32[2,4,256], index: 0, kind: input, shape index: {}]   ;;  %s225_s1 = inlined_call_operand.hbm [shape: f32[2,4,256], index: 1, kind: output, shape index: {}]  }
   0x1   :  { %7 = vsyncpa [#allocation4], 0  ;;  %s185_s6 = smov [#allocation2]  }
   0x2   :  { %s13_s7 = sshll.u32 %s185_s6, 4  ;;  %s14_s7 = int_to_ptr.vmem [resolvable:$true] %s13_s7 }
   0x3   :  { %s149_s8 = scalar_lea.vmem %s14_s7, 256  ;;  %p154_p1 = scmp.lt.s32.totalorder %s14_s7, %s14_s7 }
   0x4   :  { %p150_p0 = scmp.ne.s32.totalorder %s14_s7, %s149_s8  ;;  %p155_p2 = scmp.lt.s32.totalorder %s149_s8, %s149_s8 }
   0x6   :  { %p156_p3 = por %p155_p2, %p154_p1 }
   0x8   :  { %p157_p4 = pnand %p156_p3, %p150_p0 }
   0xa   :  { %160 = shalt.err (!%p157_p4)
}
   0xb   :  { %s186_s9 = smov 128   ;;  %s187_s10 = smov 8  }
   0xc   :  { %19 = dma.hbm_to_vmem [thread:$0]  %s224_s0, 256, %s14_s7, [#allocation3], %s186_s9, %s186_s9, %s187_s10  }
   0xd   :  { %181 = dma.done.wait [#allocation3], 256  }
   0xe   :  { %182 = vsyncadd [#allocation3], 4294967040  ;;  %v205_v0 = vld [vmem:[#allocation2] sm:$0xff]  ;;  %vm33_vm0 = vcmask 1043456   ;;  %v207_v1 = vld [vmem:[#allocation2 + $0x8] sm:$0xff]  ;;  %s188_s0 = smov [#allocation5]  }
   0xf   :  { %v25_v2 = vmul.f32 %v205_v0, %v205_v0  ;;  %v26_v3 = vmul.f32 %v207_v1, %v207_v1  ;;  %s113_s13 = sshll.u32 %s188_s0, 4  ;;  %s114_s13 = int_to_ptr.vmem [resolvable:$true] %s113_s13 }
  0x10   :  { %s161_s14 = scalar_lea.vmem %s114_s13, 256  ;;  %p166_p6 = scmp.lt.s32.totalorder %s114_s13, %s114_s13 }
  0x11   :  { %v29_v4 = vcombine.high %v25_v2, %v25_v2  ;;  %v34_v5 = vsel %vm33_vm0, %v25_v2, 0.0  ;;  %v30_v6 = vcombine.high %v26_v3, %v26_v3  ;;  %v48_v7 = vsel %vm33_vm0, %v26_v3, 0.0  ;;  %p162_p5 = scmp.ne.s32.totalorder %s114_s13, %s161_s14  ;;  %p167_p7 = scmp.lt.s32.totalorder %s161_s14, %s161_s14 }
  0x12   :  { %v35_v8 = vrot.slane %v34_v5, 4  ;;  %v49_v9 = vrot.slane %v48_v7, 4 }
  0x13   :  { %v41_v10 = vsel %vm33_vm0, %v29_v4, 0.0  ;;  %v55_v11 = vsel %vm33_vm0, %v30_v6, 0.0  ;;  %p168_p8 = por %p167_p7, %p166_p6 }
  0x14   :  { %v36_v12 = vadd.f32 %v35_v8, %v34_v5  ;;  %v42_v13 = vrot.slane %v41_v10, 4  ;;  %v50_v14 = vadd.f32 %v49_v9, %v48_v7  ;;  %v56_v15 = vrot.slane %v55_v11, 4 }
  0x15   :  { %p169_p9 = pnand %p168_p8, %p162_p5 }
  0x16   :  { %v37_v16 = vrot.slane %v36_v12, 2  ;;  %v43_v17 = vadd.f32 %v42_v13, %v41_v10  ;;  %v51_v18 = vrot.slane %v50_v14, 2  ;;  %v57_v19 = vadd.f32 %v56_v15, %v55_v11 }
  0x18   :  { %v38_v20 = vadd.f32 %v37_v16, %v36_v12  ;;  %v44_v21 = vrot.slane %v43_v17, 2  ;;  %v52_v22 = vadd.f32 %v51_v18, %v50_v14  ;;  %v58_v23 = vrot.slane %v57_v19, 2 }
  0x1a   :  { %v39_v24 = vrot.slane %v38_v20, 1  ;;  %v45_v25 = vadd.f32 %v44_v21, %v43_v17  ;;  %v53_v26 = vrot.slane %v52_v22, 1  ;;  %v59_v27 = vadd.f32 %v58_v23, %v57_v19 }
  0x1c   :  { %v40_v28 = vadd.f32 %v39_v24, %v38_v20  ;;  %v46_v29 = vrot.slane %v45_v25, 1  ;;  %v54_v30 = vadd.f32 %v53_v26, %v52_v22  ;;  %v60_v31 = vrot.slane %v59_v27, 1 }
  0x1e   :  { %v47_v32 = vadd.f32 %v46_v29, %v45_v25  ;;  %129 = vrsqrt.f32 %v40_v28  ;;  %v61_v33 = vadd.f32 %v60_v31, %v59_v27  ;;  %vm64_vm1 = vcmp.eq.f32.partialorder %v40_v28, inf }
  0x1f   :  { %131 = vrsqrt.f32 %v54_v30  ;;  %vm66_vm2 = vcmp.eq.f32.partialorder %v40_v28, 0.0  ;;  %v67_v35 = vand.u32 2147483648, %v40_v28  ;;  %vm78_vm4 = vcmp.eq.f32.partialorder %v54_v30, inf }
  0x20   :  { %133 = vrsqrt.f32 %v47_v32  ;;  %vm71_vm3 = vcmp.eq.f32.partialorder %v47_v32, inf  ;;  %v81_v38 = vand.u32 2147483648, %v54_v30  ;;  %vm73_vm5 = vcmp.eq.f32.partialorder %v47_v32, 0.0 }
  0x21   :  { %135 = vrsqrt.f32 %v61_v33  ;;  %v74_v40 = vand.u32 2147483648, %v47_v32  ;;  %vm80_vm6 = vcmp.eq.f32.partialorder %v54_v30, 0.0  ;;  %vm85_vm7 = vcmp.eq.f32.partialorder %v61_v33, inf }
  0x22   :  { %v88_v45 = vand.u32 2147483648, %v61_v33  ;;  %vm87_vm8 = vcmp.eq.f32.partialorder %v61_v33, 0.0 }
  0x2b   :  { %v130_v34 = vpop.eup %129 }
  0x2c   :  { %v132_v36 = vpop.eup %131  ;;  %v63_v37 = vmul.f32 %v130_v34, %v40_v28 }
  0x2d   :  { %v134_v39 = vpop.eup %133  ;;  %v77_v41 = vmul.f32 %v132_v36, %v54_v30 }
  0x2e   :  { %v136_v42 = vpop.eup %135  ;;  %v65_v43 = vsel %vm64_vm1, %v40_v28, %v63_v37  ;;  %v70_v44 = vmul.f32 %v134_v39, %v47_v32 }
  0x2f   :  { %v68_v46 = vsel %vm66_vm2, %v67_v35, %v65_v43  ;;  %v79_v47 = vsel %vm78_vm4, %v54_v30, %v77_v41  ;;  %v84_v48 = vmul.f32 %v136_v42, %v61_v33 }
  0x30   :  { %v72_v49 = vsel %vm71_vm3, %v47_v32, %v70_v44  ;;  %v90_v50 = vmax.f32 %v68_v46, 0.0  ;;  %v82_v51 = vsel %vm80_vm6, %v81_v38, %v79_v47 }
  0x31   :  { %v75_v52 = vsel %vm73_vm5, %v74_v40, %v72_v49  ;;  %v86_v53 = vsel %vm85_vm7, %v61_v33, %v84_v48  ;;  %v92_v54 = vmax.f32 %v82_v51, 0.0 }
  0x32   :  { %v91_v55 = vmax.f32 %v75_v52, 0.0  ;;  %v89_v56 = vsel %vm87_vm8, %v88_v45, %v86_v53 }
  0x33   :  { %v93_v57 = vmax.f32 %v89_v56, 0.0 }
  0x34   :  { %v98_v58 = vcombine.low %v90_v50, %v91_v55 }
  0x35   :  { %v99_v59 = vcombine.low %v92_v54, %v93_v57 }
  0x36   :  { %137 = vrcp.f32 %v98_v58 }
  0x37   :  { %139 = vrcp.f32 %v99_v59 }
  0x43   :  { %v138_v60 = vpop.eup %137 }
  0x44   :  { %v140_v61 = vpop.eup %139  ;;  %v103_v62 = vmul.f32 %v138_v60, %v205_v0 }
  0x45   :  { %v105_v63 = vmul.f32 %v140_v61, %v207_v1 }
  0x46   :  { %106 = vst [vmem:[#allocation5] sm:$0xff] %v103_v62 }
  0x47   :  { %107 = vst [vmem:[#allocation5 + $0x8] sm:$0xff] %v105_v63 }
  0x48   :  { %172 = shalt.err (!%p169_p9)
}
  0x49   :  { %119 = dma.vmem_to_hbm [thread:$0]  %s114_s13, 256, %s225_s1, [#allocation4], %s186_s9, %s186_s9, %s187_s10  }
  0x4a   :  { %183 = dma.done.wait [#allocation4], 256  }
  0x4b   :  { %184 = vsyncadd [#allocation4], 4294967040 }
  0x4c   :  { %123 = vsyncpa [#allocation3], 1 }
  0x4d   :  { %124 = vsyncpa [#allocation4], 1 }

</bundles_post_ra>
